<compile_context>
chip_gen: v6e
topology: v6e:2x2x1
jax: 0.10.0
libtpu: 0.0.40
codegen_flags: <defaults>
</compile_context>

<pallas_src>
import functools

import jax
import jax.numpy as jnp
from jax.experimental import pallas as pl
from jax.experimental.pallas import tpu as pltpu


def _dpp_kernel(x_ref, st_ref, m_ref, out_ref, vuh_ref):
    """One row-tile of the preprocessor.

    x_ref  : (tm, 2*NNBD)  row r = [gd_r | gn_r]  (contiguous, lane slices)
    st_ref : (NNBD, NDOF)  S^T, resident across the grid
    m_ref  : (NNBD, NNBD)  M = S^T @ N^T, resident across the grid
    out_ref: (tm, NNBD)    gn - vn
    vuh_ref: (tm, NDOF)    vuh = gd @ S^T (the module's `self.vuh` side output)
    """
    nnbd = out_ref.shape[-1]
    gd = x_ref[:, :nnbd]                      # Dirichlet data
    gn = x_ref[:, nnbd:]                      # Neumann data
    gd_c = gd.astype(st_ref.dtype)            # bf16 operands, f32 accumulation

    # vuh = gd @ S^T
    vuh = jnp.dot(gd_c, st_ref[...], preferred_element_type=jnp.float32)
    vuh_ref[...] = vuh.astype(vuh_ref.dtype)

    # vn = gd @ (S^T @ N^T) == (gd @ S^T) @ N^T; independent of vuh so both MXU
    # calls can overlap.  Padded rows of a partial last tile only produce garbage
    # in masked-out output rows (no reductions across the row tile here).
    vn = jnp.dot(gd_c, m_ref[...], preferred_element_type=jnp.float32)
    out_ref[...] = (gn.astype(jnp.float32) - vn).astype(out_ref.dtype)


def prepare_operators(s_t, n_t, compute_dtype=jnp.bfloat16):
    """One-time prep of the fixed solver operators.

    Returns (S^T, M) with M = S^T @ N^T, both cast to `compute_dtype`.
    TODO(synk): the real LaplaceFEMSolver derives these maps from a factorized
    FEM stiffness matrix; here they are taken as explicit dense operators.
    """
    m = jnp.dot(s_t.astype(jnp.float32), n_t.astype(jnp.float32),
                precision=jax.lax.Precision.HIGHEST)
    return s_t.astype(compute_dtype), m.astype(compute_dtype)


def _round_up(v, m):
    return ((v + m - 1) // m) * m


def _pick_tm(bc, tm):
    """Clamp the row tile to the batch; prefer >=2 grid steps (v7x megacore)."""
    tm_eff = min(tm, bc)
    if bc >= 16 and tm_eff >= bc:
        tm_eff = max(8, _round_up((bc + 1) // 2, 8))
    return tm_eff


@functools.partial(jax.jit, static_argnames=("tm", "single_buffer_weights"))
def _data_preprocessor_impl(x, s_t, m, *, tm, single_buffer_weights):
    batch, channel, two, nnbd = x.shape
    assert two == 2
    ndof = s_t.shape[1]
    bc = batch * channel

    # Free, contiguous reshape: row r = [gd_r (NNBD) | gn_r (NNBD)]. gd/gn are
    # split inside the kernel, so no extra HBM pass materializes them.
    xr = x.reshape(bc, 2 * nnbd)

    tm_eff = _pick_tm(bc, tm)
    grid = (pl.cdiv(bc, tm_eff),)

    def _weight_spec(shape):
        if single_buffer_weights:
            # Constant index_map -> weights stay resident; one VMEM buffer halves
            # their footprint (matters on v7x's 64 MiB VMEM at real FEM sizes).
            return pl.BlockSpec(shape, lambda i: (0, 0),
                                pipeline_mode=pl.Buffered(1))
        return pl.BlockSpec(shape, lambda i: (0, 0))

    isz_x = x.dtype.itemsize
    isz_w = s_t.dtype.itemsize
    w_bufs = 1 if single_buffer_weights else 2
    vmem_est = (
        w_bufs * (nnbd * ndof + nnbd * nnbd) * isz_w      # resident weights
        + 2 * tm_eff * 2 * nnbd * isz_x                   # input tiles (x2 buffers)
        + 2 * tm_eff * (nnbd + ndof) * isz_x              # output tiles (x2 buffers)
        + 2 * tm_eff * (nnbd + ndof) * 4                  # f32 intermediates
    )
    vmem_limit = int(min(64 * 1024 * 1024, max(32 * 1024 * 1024, 2 * vmem_est)))

    flops = 2 * bc * nnbd * (ndof + nnbd)
    bytes_accessed = (bc * 2 * nnbd * isz_x
                      + (nnbd * ndof + nnbd * nnbd) * isz_w
                      + bc * (nnbd + ndof) * isz_x)

    out, vuh = pl.pallas_call(
        _dpp_kernel,
        out_shape=(
            jax.ShapeDtypeStruct((bc, nnbd), x.dtype),
            jax.ShapeDtypeStruct((bc, ndof), x.dtype),
        ),
        grid_spec=pltpu.PrefetchScalarGridSpec(
            num_scalar_prefetch=0,
            grid=grid,
            in_specs=[
                pl.BlockSpec((tm_eff, 2 * nnbd), lambda i: (i, 0)),  # [gd|gn] rows
                _weight_spec((nnbd, ndof)),                          # S^T
                _weight_spec((nnbd, nnbd)),                          # M = S^T N^T
            ],
            out_specs=[
                pl.BlockSpec((tm_eff, nnbd), lambda i: (i, 0)),      # gn - vn
                pl.BlockSpec((tm_eff, ndof), lambda i: (i, 0)),      # vuh
            ],
        ),
        compiler_params=pltpu.CompilerParams(
            dimension_semantics=("parallel",),
            vmem_limit_bytes=vmem_limit,
        ),
        cost_estimate=pl.CostEstimate(
            flops=flops, transcendentals=0, bytes_accessed=bytes_accessed),
    )(xr, s_t, m)

    return out.reshape(batch, channel, nnbd), vuh


_SINGLE_BUFFER_OK = None


def data_preprocessor(x, s_t, m, *, tm=128):
    """x: (BATCH, CHANNEL, 2, NNBD); (s_t, m) from prepare_operators().

    Returns (gnvn, vuh) like the PyTorch module (vuh is the stored side output).
    `tm` must be a multiple of 8.
    """
    global _SINGLE_BUFFER_OK
    if _SINGLE_BUFFER_OK is None:
        try:
            res = _data_preprocessor_impl(x, s_t, m, tm=tm,
                                          single_buffer_weights=True)
            _SINGLE_BUFFER_OK = True
            return res
        except Exception:
            # Installed Pallas does not accept pipeline_mode=pl.Buffered(1);
            # fall back to default double-buffered weights.
            _SINGLE_BUFFER_OK = False
    return _data_preprocessor_impl(x, s_t, m, tm=tm,
                                   single_buffer_weights=_SINGLE_BUFFER_OK)


def reference(x, s_t, n_t):
    batch, channel, _, nnbd = x.shape
    xr = x.reshape(-1, 2, nnbd)
    gd, gn = xr[:, 0, :], xr[:, 1, :]
    vuh = gd @ s_t
    vn = vuh @ n_t
    return (gn - vn).reshape(batch, channel, -1), vuh


if __name__ == "__main__":
    # Small, (8,128)-friendly shapes consistent with the module's forward.
    BATCH, CHANNEL, NNBD, NDOF = 2, 4, 128, 256

    key = jax.random.PRNGKey(0)
    kx, ks, kn = jax.random.split(key, 3)

    # Input: (BATCH, CHANNEL, 2, NNBD) -- the size-2 dim holds (gd, gn) pairs.
    x = jax.random.normal(kx, (BATCH, CHANNEL, 2, NNBD), dtype=jnp.float32)

    # Deterministic synthetic solver operators (stand-ins for the FEM
    # solve_from_potential / normal_derivative linear maps).
    s_t = (jax.random.normal(ks, (NNBD, NDOF), dtype=jnp.float32)
           / jnp.sqrt(jnp.float32(NNBD)))
    n_t = (jax.random.normal(kn, (NDOF, NNBD), dtype=jnp.float32)
           / jnp.sqrt(jnp.float32(NDOF)))

    ref_out, ref_vuh = reference(x, s_t, n_t)

    # 1) f32 operators: tight structural check of the kernel.
    st32, m32 = prepare_operators(s_t, n_t, compute_dtype=jnp.float32)
    out32, vuh32 = data_preprocessor(x, st32, m32)
    jax.block_until_ready((out32, vuh32))
    assert out32.shape == (BATCH, CHANNEL, NNBD)
    assert vuh32.shape == (BATCH * CHANNEL, NDOF)
    assert jnp.allclose(out32, ref_out, atol=1e-4, rtol=1e-4)
    assert jnp.allclose(vuh32, ref_vuh, atol=1e-4, rtol=1e-4)

    # 2) bf16 operators with f32 accumulation (fast path): looser tolerance.
    stbf, mbf = prepare_operators(s_t, n_t, compute_dtype=jnp.bfloat16)
    outbf, vuhbf = data_preprocessor(x, stbf, mbf)
    jax.block_until_ready((outbf, vuhbf))
    assert jnp.allclose(outbf, ref_out, atol=3e-2, rtol=3e-2)
    assert jnp.allclose(vuhbf, ref_vuh, atol=3e-2, rtol=3e-2)

    print("KERNEL_OK")
</pallas_src>

<mosaic_0001>
module attributes {stable_mosaic.version = 11 : i64} {
  func.func @_dpp_kernel(%arg0: i32, %arg1: memref<8x256xf32, #tpu.memory_space<vmem>>, %arg2: memref<128x256xf32, #tpu.memory_space<vmem>>, %arg3: memref<128x128xf32, #tpu.memory_space<vmem>>, %arg4: memref<8x128xf32, #tpu.memory_space<vmem>>, %arg5: memref<8x256xf32, #tpu.memory_space<vmem>>) attributes {dimension_semantics = [#tpu.dimension_semantics<parallel>], iteration_bounds = array<i64: 1>, scalar_prefetch = 0 : i64, scratch_operands = 0 : i64, tpu.core_type = #tpu.core_type<tc>, window_params = [{transform_indices = @transform_0, window_bounds = array<i64: 8, 256>}, {pipeline_mode = #tpu.pipeline_mode<synchronous>, transform_indices = @transform_1, window_bounds = array<i64: 128, 256>}, {pipeline_mode = #tpu.pipeline_mode<synchronous>, transform_indices = @transform_2, window_bounds = array<i64: 128, 128>}, {transform_indices = @transform_3, window_bounds = array<i64: 8, 128>}, {transform_indices = @transform_4, window_bounds = array<i64: 8, 256>}]} {
    %c0 = arith.constant 0 : index
    %c0_0 = arith.constant 0 : index
    %0 = vector.load %arg1[%c0, %c0_0] : memref<8x256xf32, #tpu.memory_space<vmem>>, vector<8x128xf32>
    %c0_1 = arith.constant 0 : index
    %c128 = arith.constant 128 : index
    %1 = vector.load %arg1[%c0_1, %c128] : memref<8x256xf32, #tpu.memory_space<vmem>>, vector<8x128xf32>
    %c0_2 = arith.constant 0 : index
    %c0_3 = arith.constant 0 : index
    %2 = vector.load %arg2[%c0_2, %c0_3] : memref<128x256xf32, #tpu.memory_space<vmem>>, vector<128x256xf32>
    %cst = arith.constant dense<0.000000e+00> : vector<8x256xf32>
    %3 = tpu.matmul %0, %2, %cst {dimension_numbers = #tpu.dot_dimension_numbers<[1], [0], [0], [1], [0, 0, 1, 1], [], []>} : vector<8x128xf32>, vector<128x256xf32>, vector<8x256xf32> -> vector<8x256xf32>
    %c0_4 = arith.constant 0 : index
    %c0_5 = arith.constant 0 : index
    %4 = vector.load %arg5[%c0_4, %c0_5] : memref<8x256xf32, #tpu.memory_space<vmem>>, vector<8x256xf32>
    tpu.vector_store %arg5[%c0_4, %c0_5], %3 {strides = array<i32>} : memref<8x256xf32, #tpu.memory_space<vmem>>, vector<8x256xf32>,
    %c0_6 = arith.constant 0 : index
    %c0_7 = arith.constant 0 : index
    %5 = vector.load %arg3[%c0_6, %c0_7] : memref<128x128xf32, #tpu.memory_space<vmem>>, vector<128x128xf32>
    %cst_8 = arith.constant dense<0.000000e+00> : vector<8x128xf32>
    %6 = tpu.matmul %0, %5, %cst_8 {dimension_numbers = #tpu.dot_dimension_numbers<[1], [0], [0], [1], [0, 0, 1, 1], [], []>} : vector<8x128xf32>, vector<128x128xf32>, vector<8x128xf32> -> vector<8x128xf32>
    %7 = arith.subf %1, %6 : vector<8x128xf32>
    %c0_9 = arith.constant 0 : index
    %c0_10 = arith.constant 0 : index
    %8 = vector.load %arg4[%c0_9, %c0_10] : memref<8x128xf32, #tpu.memory_space<vmem>>, vector<8x128xf32>
    tpu.vector_store %arg4[%c0_9, %c0_10], %7 {strides = array<i32>} : memref<8x128xf32, #tpu.memory_space<vmem>>, vector<8x128xf32>,
    return
  }
  func.func @transform_0(%arg0: i32) -> (i32, i32) {
    %c0_i32 = arith.constant 0 : i32
    %c0_i32_0 = arith.constant 0 : i32
    return %arg0, %c0_i32 : i32, i32
  }
  func.func @transform_1(%arg0: i32) -> (i32, i32) {
    %c0_i32 = arith.constant 0 : i32
    %c0_i32_0 = arith.constant 0 : i32
    %c0_i32_1 = arith.constant 0 : i32
    return %c0_i32, %c0_i32_0 : i32, i32
  }
  func.func @transform_2(%arg0: i32) -> (i32, i32) {
    %c0_i32 = arith.constant 0 : i32
    %c0_i32_0 = arith.constant 0 : i32
    %c0_i32_1 = arith.constant 0 : i32
    return %c0_i32, %c0_i32_0 : i32, i32
  }
  func.func @transform_3(%arg0: i32) -> (i32, i32) {
    %c0_i32 = arith.constant 0 : i32
    %c0_i32_0 = arith.constant 0 : i32
    return %arg0, %c0_i32 : i32, i32
  }
  func.func @transform_4(%arg0: i32) -> (i32, i32) {
    %c0_i32 = arith.constant 0 : i32
    %c0_i32_0 = arith.constant 0 : i32
    return %arg0, %c0_i32 : i32, i32
  }
}

module attributes {stable_mosaic.version = 11 : i64} {
  func.func @_dpp_kernel(%arg0: i32, %arg1: memref<8x256xf32, #tpu.memory_space<vmem>>, %arg2: memref<128x256xf32, #tpu.memory_space<vmem>>, %arg3: memref<128x128xf32, #tpu.memory_space<vmem>>, %arg4: memref<8x128xf32, #tpu.memory_space<vmem>>, %arg5: memref<8x256xf32, #tpu.memory_space<vmem>>) attributes {dimension_semantics = [#tpu.dimension_semantics<parallel>], iteration_bounds = array<i64: 1>, scalar_prefetch = 0 : i64, scratch_operands = 0 : i64, tpu.core_type = #tpu.core_type<tc>, window_params = [{transform_indices = @transform_0, window_bounds = array<i64: 8, 256>}, {pipeline_mode = #tpu.pipeline_mode<synchronous>, transform_indices = @transform_1, window_bounds = array<i64: 128, 256>}, {pipeline_mode = #tpu.pipeline_mode<synchronous>, transform_indices = @transform_2, window_bounds = array<i64: 128, 128>}, {transform_indices = @transform_3, window_bounds = array<i64: 8, 128>}, {transform_indices = @transform_4, window_bounds = array<i64: 8, 256>}]} {
    %c0 = arith.constant 0 : index
    %c0_0 = arith.constant 0 : index
    %0 = vector.load %arg1[%c0, %c0_0] : memref<8x256xf32, #tpu.memory_space<vmem>>, vector<8x128xf32>
    %c0_1 = arith.constant 0 : index
    %c128 = arith.constant 128 : index
    %1 = vector.load %arg1[%c0_1, %c128] : memref<8x256xf32, #tpu.memory_space<vmem>>, vector<8x128xf32>
    %c0_2 = arith.constant 0 : index
    %c0_3 = arith.constant 0 : index
    %2 = vector.load %arg2[%c0_2, %c0_3] : memref<128x256xf32, #tpu.memory_space<vmem>>, vector<128x256xf32>
    %cst = arith.constant dense<0.000000e+00> : vector<8x256xf32>
    %3 = tpu.matmul %0, %2, %cst {dimension_numbers = #tpu.dot_dimension_numbers<[1], [0], [0], [1], [0, 0, 1, 1], [], []>} : vector<8x128xf32>, vector<128x256xf32>, vector<8x256xf32> -> vector<8x256xf32>
    %c0_4 = arith.constant 0 : index
    %c0_5 = arith.constant 0 : index
    %4 = vector.load %arg5[%c0_4, %c0_5] : memref<8x256xf32, #tpu.memory_space<vmem>>, vector<8x256xf32>
    tpu.vector_store %arg5[%c0_4, %c0_5], %3 {strides = array<i32>} : memref<8x256xf32, #tpu.memory_space<vmem>>, vector<8x256xf32>,
    %c0_6 = arith.constant 0 : index
    %c0_7 = arith.constant 0 : index
    %5 = vector.load %arg3[%c0_6, %c0_7] : memref<128x128xf32, #tpu.memory_space<vmem>>, vector<128x128xf32>
    %cst_8 = arith.constant dense<0.000000e+00> : vector<8x128xf32>
    %6 = tpu.matmul %0, %5, %cst_8 {dimension_numbers = #tpu.dot_dimension_numbers<[1], [0], [0], [1], [0, 0, 1, 1], [], []>} : vector<8x128xf32>, vector<128x128xf32>, vector<8x128xf32> -> vector<8x128xf32>
    %7 = arith.subf %1, %6 : vector<8x128xf32>
    %c0_9 = arith.constant 0 : index
    %c0_10 = arith.constant 0 : index
    %8 = vector.load %arg4[%c0_9, %c0_10] : memref<8x128xf32, #tpu.memory_space<vmem>>, vector<8x128xf32>
    tpu.vector_store %arg4[%c0_9, %c0_10], %7 {strides = array<i32>} : memref<8x128xf32, #tpu.memory_space<vmem>>, vector<8x128xf32>,
    return
  }
  func.func @transform_0(%arg0: i32) -> (i32, i32) {
    %c0_i32 = arith.constant 0 : i32
    %c0_i32_0 = arith.constant 0 : i32
    return %arg0, %c0_i32 : i32, i32
  }
  func.func @transform_1(%arg0: i32) -> (i32, i32) {
    %c0_i32 = arith.constant 0 : i32
    %c0_i32_0 = arith.constant 0 : i32
    %c0_i32_1 = arith.constant 0 : i32
    return %c0_i32, %c0_i32_0 : i32, i32
  }
  func.func @transform_2(%arg0: i32) -> (i32, i32) {
    %c0_i32 = arith.constant 0 : i32
    %c0_i32_0 = arith.constant 0 : i32
    %c0_i32_1 = arith.constant 0 : i32
    return %c0_i32, %c0_i32_0 : i32, i32
  }
  func.func @transform_3(%arg0: i32) -> (i32, i32) {
    %c0_i32 = arith.constant 0 : i32
    %c0_i32_0 = arith.constant 0 : i32
    return %arg0, %c0_i32 : i32, i32
  }
  func.func @transform_4(%arg0: i32) -> (i32, i32) {
    %c0_i32 = arith.constant 0 : i32
    %c0_i32_0 = arith.constant 0 : i32
    return %arg0, %c0_i32 : i32, i32
  }
}

</mosaic_0001>

<bundles_post_ra>
// kernel: _data_preprocessor_impl.1
= control target key start
LH: loop header
LB: loop body
LE: loop exit
PB: predicated region body
PF: predicated region fallthrough
CT: control target
= control target key end

     0   :  { %10 = vsyncpa [#allocation3], 0  ;;  %s492_s0 = inlined_call_operand.vmem [shape: f32[8,256], index: 0, kind: input, shape index: {}]   ;;  %s493_s1 = inlined_call_operand.hbm [shape: f32[128,256], index: 1, kind: input, shape index: {}]   ;;  %s494_s2 = inlined_call_operand.hbm [shape: f32[128,128], index: 2, kind: input, shape index: {}]   ;;  %s495_s3 = inlined_call_operand.hbm [shape: f32[8,128], index: 3, kind: output, shape index: {0}]   ;;  %s496_s4 = inlined_call_operand.hbm [shape: f32[8,256], index: 4, kind: output, shape index: {1}]  }
   0x1   :  { %11 = vsyncpa [#allocation6], 0 }
   0x2   :  { %12 = vsyncpa [#allocation4], 0 }
   0x3   :  { %13 = vsyncpa [#allocation9], 0  ;;  %s421_s15 = smov [#allocation2]  }
   0x4   :  { %s21_s16 = sshll.u32 %s421_s15, 4  ;;  %s22_s16 = int_to_ptr.vmem [resolvable:$true] %s21_s16 }
   0x5   :  { %s341_s17 = scalar_lea.vmem %s22_s16, 4096  ;;  %p346_p1 = scmp.lt.s32.totalorder %s22_s16, %s22_s16 }
   0x6   :  { %p342_p0 = scmp.ne.s32.totalorder %s22_s16, %s341_s17  ;;  %p347_p2 = scmp.lt.s32.totalorder %s341_s17, %s341_s17 }
   0x8   :  { %p348_p3 = por %p347_p2, %p346_p1 }
   0xa   :  { %p349_p4 = pnand %p348_p3, %p342_p0 }
   0xc   :  { %352 = shalt.err (!%p349_p4)
}
   0xd   :  { %s422_s18 = smov 256   ;;  %s423_s19 = smov 16  }
   0xe   :  { %27 = dma.hbm_to_vmem [thread:$0]  %s493_s1, 4096, %s22_s16, [#allocation3], %s422_s18, %s422_s18, %s423_s19  }
   0xf   :  { %s424_s22 = smov [#allocation5]  }
  0x10   :  { %s33_s23 = sshll.u32 %s424_s22, 4  ;;  %s34_s23 = int_to_ptr.vmem [resolvable:$true] %s33_s23 }
  0x11   :  { %s361_s24 = scalar_lea.vmem %s34_s23, 2048  ;;  %p366_p6 = scmp.lt.s32.totalorder %s34_s23, %s34_s23 }
  0x12   :  { %p362_p5 = scmp.ne.s32.totalorder %s34_s23, %s361_s24  ;;  %p367_p7 = scmp.lt.s32.totalorder %s361_s24, %s361_s24 }
  0x14   :  { %p368_p8 = por %p367_p7, %p366_p6 }
  0x16   :  { %p369_p9 = pnand %p368_p8, %p362_p5 }
  0x18   :  { %372 = shalt.err (!%p369_p9)
}
  0x19   :  { %s425_s25 = smov 128   ;;  %s426_s26 = smov 8  }
  0x1a   :  { %39 = dma.hbm_to_vmem [thread:$0]  %s494_s2, 2048, %s34_s23, [#allocation6], %s425_s25, %s425_s25, %s426_s26  }
  0x1b   :  { %413 = dma.done.wait [#allocation3], 4096  }
  0x1c   :  { %414 = vsyncadd [#allocation3], 4294963200 }
  0x1d   :  { %415 = dma.done.wait [#allocation6], 2048  }
  0x1e   :  { %416 = vsyncadd [#allocation6], 4294965248  ;;  %v427_v0 = vmov 0.0   ;;  %vm428_vm0 = vmmov 0   ;;  %v79_v1 = vld [vmem:[#allocation2 + $0xf8] sm:$0xff]  ;;  %v78_v3 = vld [vmem:[#allocation2 + $0xf0] sm:$0xff] }
  0x1f   :  { %288 = vmatprep.subr.mxu1 %v427_v0  ;;  %320 = vmatprep.mubr.msk.f32.mxu1 %vm428_vm0, %v427_v0  ;;  %v168_v2 = vld [vmem:[#allocation5 + $0x78] sm:$0xff]  ;;  %v77_v4 = vld [vmem:[#allocation2 + $0xe8] sm:$0xff]  ;;  %v167_v5 = vld [vmem:[#allocation5 + $0x70] sm:$0xff]  ;;  %s429_s5 = smov [#allocation7]   ;;  %s430_s7 = smov [#allocation8]  }
  0x20   :  { %144 = vmatprep.mubr.f32.mxu0 %v427_v0  ;;  %80 = vmatprep.subr.mxu0 %v79_v1  ;;  %v76_v6 = vld [vmem:[#allocation2 + $0xe0] sm:$0xff]  ;;  %v75_v7 = vld [vmem:[#allocation2 + $0xd8] sm:$0xff]  ;;  %v166_v8 = vld [vmem:[#allocation5 + $0x68] sm:$0xff]  ;;  %s247_s6 = sshll.u32 %s429_s5, 4  ;;  %s257_s8 = sshll.u32 %s430_s7, 4  ;;  %s248_s6 = int_to_ptr.vmem [resolvable:$true] %s247_s6  ;;  %s258_s8 = int_to_ptr.vmem [resolvable:$true] %s257_s8 }
  0x21   :  { %289 = vmatpush3.msra.mxu1 %v168_v2  ;;  %81 = vmatpush1.msra.mxu0 %v78_v3  ;;  %v74_v9 = vld [vmem:[#allocation2 + $0xd0] sm:$0xff]  ;;  %v73_v10 = vld [vmem:[#allocation2 + $0xc8] sm:$0xff]  ;;  %v165_v11 = vld [vmem:[#allocation5 + $0x60] sm:$0xff]  ;;  %s373_s9 = scalar_lea.vmem %s248_s6, 128  ;;  %p378_p11 = scmp.lt.s32.totalorder %s248_s6, %s248_s6 }
  0x22   :  { %290 = vmatprep.subr.mxu1 %v427_v0  ;;  %82 = vmatprep.subr.mxu0 %v77_v4  ;;  %v72_v12 = vld [vmem:[#allocation2 + $0xc0] sm:$0xff]  ;;  %v71_v13 = vld [vmem:[#allocation2 + $0xb8] sm:$0xff]  ;;  %v70_v15 = vld [vmem:[#allocation2 + $0xb0] sm:$0xff]  ;;  %p374_p10 = scmp.ne.s32.totalorder %s248_s6, %s373_s9  ;;  %p379_p12 = scmp.lt.s32.totalorder %s373_s9, %s373_s9 }
  0x23   :  { %291 = vmatpush3.msra.mxu1 %v167_v5  ;;  %83 = vmatpush1.msra.mxu0 %v76_v6  ;;  %v164_v14 = vld [vmem:[#allocation5 + $0x58] sm:$0xff]  ;;  %v69_v16 = vld [vmem:[#allocation2 + $0xa8] sm:$0xff]  ;;  %v163_v17 = vld [vmem:[#allocation5 + $0x50] sm:$0xff] }
  0x24   :  { %292 = vmatprep.subr.mxu1 %v427_v0  ;;  %84 = vmatprep.subr.mxu0 %v75_v7  ;;  %v68_v18 = vld [vmem:[#allocation2 + $0xa0] sm:$0xff]  ;;  %v67_v19 = vld [vmem:[#allocation2 + $0x98] sm:$0xff]  ;;  %v162_v20 = vld [vmem:[#allocation5 + $0x48] sm:$0xff]  ;;  %p380_p13 = por %p379_p12, %p378_p11 }
  0x25   :  { %293 = vmatpush3.msra.mxu1 %v166_v8  ;;  %85 = vmatpush1.msra.mxu0 %v74_v9  ;;  %v66_v21 = vld [vmem:[#allocation2 + $0x90] sm:$0xff]  ;;  %v65_v22 = vld [vmem:[#allocation2 + $0x88] sm:$0xff]  ;;  %v161_v23 = vld [vmem:[#allocation5 + $0x40] sm:$0xff] }
  0x26   :  { %294 = vmatprep.subr.mxu1 %v427_v0  ;;  %86 = vmatprep.subr.mxu0 %v73_v10  ;;  %v64_v24 = vld [vmem:[#allocation2 + $0x80] sm:$0xff]  ;;  %v63_v25 = vld [vmem:[#allocation2 + $0x78] sm:$0xff]  ;;  %v62_v27 = vld [vmem:[#allocation2 + $0x70] sm:$0xff]  ;;  %p381_p0 = pnand %p380_p13, %p374_p10 }
  0x27   :  { %295 = vmatpush3.msra.mxu1 %v165_v11  ;;  %87 = vmatpush1.msra.mxu0 %v72_v12  ;;  %v160_v26 = vld [vmem:[#allocation5 + $0x38] sm:$0xff]  ;;  %v61_v28 = vld [vmem:[#allocation2 + $0x68] sm:$0xff]  ;;  %v159_v29 = vld [vmem:[#allocation5 + $0x30] sm:$0xff] }
  0x28   :  { %296 = vmatprep.subr.mxu1 %v427_v0  ;;  %88 = vmatprep.subr.mxu0 %v71_v13  ;;  %v60_v30 = vld [vmem:[#allocation2 + $0x60] sm:$0xff]  ;;  %v59_v31 = vld [vmem:[#allocation2 + $0x58] sm:$0xff]  ;;  %v158_v32 = vld [vmem:[#allocation5 + $0x28] sm:$0xff] }
  0x29   :  { %297 = vmatpush3.msra.mxu1 %v164_v14  ;;  %89 = vmatpush1.msra.mxu0 %v70_v15  ;;  %v58_v33 = vld [vmem:[#allocation2 + $0x50] sm:$0xff]  ;;  %v57_v34 = vld [vmem:[#allocation2 + $0x48] sm:$0xff]  ;;  %v157_v35 = vld [vmem:[#allocation5 + $0x20] sm:$0xff] }
  0x2a   :  { %298 = vmatprep.subr.mxu1 %v427_v0  ;;  %90 = vmatprep.subr.mxu0 %v69_v16  ;;  %v56_v36 = vld [vmem:[#allocation2 + $0x40] sm:$0xff]  ;;  %v55_v37 = vld [vmem:[#allocation2 + $0x38] sm:$0xff]  ;;  %v54_v39 = vld [vmem:[#allocation2 + $0x30] sm:$0xff] }
  0x2b   :  { %299 = vmatpush3.msra.mxu1 %v163_v17  ;;  %91 = vmatpush1.msra.mxu0 %v68_v18  ;;  %v156_v38 = vld [vmem:[#allocation5 + $0x18] sm:$0xff]  ;;  %v53_v40 = vld [vmem:[#allocation2 + $0x28] sm:$0xff]  ;;  %v155_v41 = vld [vmem:[#allocation5 + $0x10] sm:$0xff] }
  0x2c   :  { %300 = vmatprep.subr.mxu1 %v427_v0  ;;  %92 = vmatprep.subr.mxu0 %v67_v19  ;;  %v52_v42 = vld [vmem:[#allocation2 + $0x20] sm:$0xff]  ;;  %v51_v43 = vld [vmem:[#allocation2 + $0x18] sm:$0xff]  ;;  %v154_v44 = vld [vmem:[#allocation5 + $0x8] sm:$0xff] }
  0x2d   :  { %301 = vmatpush3.msra.mxu1 %v162_v20  ;;  %93 = vmatpush1.msra.mxu0 %v66_v21  ;;  %v50_v45 = vld [vmem:[#allocation2 + $0x10] sm:$0xff]  ;;  %v49_v46 = vld [vmem:[#allocation2 + $0x8] sm:$0xff]  ;;  %v153_v47 = vld [vmem:[#allocation5] sm:$0xff] }
  0x2e   :  { %302 = vmatprep.subr.mxu1 %v427_v0  ;;  %94 = vmatprep.subr.mxu0 %v65_v22  ;;  %v48_v48 = vld [vmem:[#allocation2] sm:$0xff]  ;;  %v47_v50 = vld [vmem:[%s492_s0 + $0x8] sm:$0xff] }
  0x2f   :  { %303 = vmatpush3.msra.mxu1 %v161_v23  ;;  %95 = vmatpush1.msra.mxu0 %v64_v24  ;;  %v46_v49 = vld [vmem:[%s492_s0] sm:$0xff] }
  0x30   :  { %304 = vmatprep.subr.mxu1 %v427_v0  ;;  %96 = vmatprep.subr.mxu0 %v63_v25 }
  0x31   :  { %305 = vmatpush3.msra.mxu1 %v160_v26  ;;  %97 = vmatpush1.msra.mxu0 %v62_v27 }
  0x32   :  { %306 = vmatprep.subr.mxu1 %v427_v0  ;;  %98 = vmatprep.subr.mxu0 %v61_v28 }
  0x33   :  { %307 = vmatpush3.msra.mxu1 %v159_v29  ;;  %99 = vmatpush1.msra.mxu0 %v60_v30 }
  0x34   :  { %308 = vmatprep.subr.mxu1 %v427_v0  ;;  %100 = vmatprep.subr.mxu0 %v59_v31 }
  0x35   :  { %309 = vmatpush3.msra.mxu1 %v158_v32  ;;  %101 = vmatpush1.msra.mxu0 %v58_v33 }
  0x36   :  { %310 = vmatprep.subr.mxu1 %v427_v0  ;;  %102 = vmatprep.subr.mxu0 %v57_v34 }
  0x37   :  { %311 = vmatpush3.msra.mxu1 %v157_v35  ;;  %103 = vmatpush1.msra.mxu0 %v56_v36 }
  0x38   :  { %312 = vmatprep.subr.mxu1 %v427_v0  ;;  %104 = vmatprep.subr.mxu0 %v55_v37 }
  0x39   :  { %313 = vmatpush3.msra.mxu1 %v156_v38  ;;  %105 = vmatpush1.msra.mxu0 %v54_v39 }
  0x3a   :  { %314 = vmatprep.subr.mxu1 %v427_v0  ;;  %106 = vmatprep.subr.mxu0 %v53_v40 }
  0x3b   :  { %315 = vmatpush3.msra.mxu1 %v155_v41  ;;  %107 = vmatpush1.msra.mxu0 %v52_v42 }
  0x3c   :  { %316 = vmatprep.subr.mxu1 %v427_v0  ;;  %108 = vmatprep.subr.mxu0 %v51_v43 }
  0x3d   :  { %317 = vmatpush3.msra.mxu1 %v154_v44  ;;  %109 = vmatpush1.msra.mxu0 %v50_v45 }
  0x3e   :  { %318 = vmatprep.subr.mxu1 %v427_v0  ;;  %110 = vmatprep.subr.mxu0 %v49_v46 }
  0x3f   :  { %319 = vmatpush3.msra.mxu1 %v153_v47  ;;  %111 = vmatpush1.msra.mxu0 %v48_v48 }
  0x40   :  { %321 = vmatmul.mubr.f32.vlgmr.msra.gmra.mxu1 %v46_v49  ;;  %145 = vmatmul.mubr.f32.vlgmr.msra.gmra.mxu0 %v46_v49 }
 0x100   :  { %v235_v51 = vpop.f32.mrf.mxu1  ;;  %v146_v53 = vpop.f32.mrf.mxu0 }
 0x101   :  { %v239_v52 = vsub.f32 %v47_v50, %v235_v51  ;;  %151 = vst [vmem:[#allocation8] sm:$0xff] %v146_v53 }
 0x102   :  { %v322_v54 = vpop.f32.mrf.mxu1  ;;  %v148_v55 = vpop.f32.mrf.mxu0 }
 0x103   :  { %240 = vst [vmem:[#allocation7] sm:$0xff] %v239_v52  ;;  %152 = vst [vmem:[#allocation8 + $0x8] sm:$0xff] %v148_v55 }
 0x104   :  { %384 = shalt.err (!%p381_p0)
}
 0x105   :  { %250 = dma.vmem_to_hbm [thread:$0]  %s248_s6, 128, %s495_s3, [#allocation4]  }
 0x106   :  { %s393_s11 = scalar_lea.vmem %s258_s8, 256  ;;  %p398_p2 = scmp.lt.s32.totalorder %s258_s8, %s258_s8 }
 0x107   :  { %p394_p1 = scmp.ne.s32.totalorder %s258_s8, %s393_s11  ;;  %p399_p3 = scmp.lt.s32.totalorder %s393_s11, %s393_s11 }
 0x109   :  { %p400_p4 = por %p399_p3, %p398_p2 }
 0x10b   :  { %p401_p5 = pnand %p400_p4, %p394_p1 }
 0x10d   :  { %404 = shalt.err (!%p401_p5)
}
 0x10e   :  { %260 = dma.vmem_to_hbm [thread:$0]  %s258_s8, 256, %s496_s4, [#allocation9]  }
 0x10f   :  { %417 = dma.done.wait [#allocation4], 128  }
 0x110   :  { %418 = vsyncadd [#allocation4], 4294967168 }
 0x111   :  { %419 = dma.done.wait [#allocation9], 256  }
 0x112   :  { %420 = vsyncadd [#allocation9], 4294967040 }
 0x113   :  { %267 = vsyncpa [#allocation3], 1 }
 0x114   :  { %268 = vsyncpa [#allocation6], 1 }
 0x115   :  { %269 = vsyncpa [#allocation4], 1 }
 0x116   :  { %270 = vsyncpa [#allocation9], 1 }

// kernel: _data_preprocessor_impl.1
= control target key start
LH: loop header
LB: loop body
LE: loop exit
PB: predicated region body
PF: predicated region fallthrough
CT: control target
= control target key end

     0   :  { %10 = vsyncpa [#allocation3], 0  ;;  %s492_s0 = inlined_call_operand.vmem [shape: f32[8,256], index: 0, kind: input, shape index: {}]   ;;  %s493_s1 = inlined_call_operand.hbm [shape: f32[128,256], index: 1, kind: input, shape index: {}]   ;;  %s494_s2 = inlined_call_operand.hbm [shape: f32[128,128], index: 2, kind: input, shape index: {}]   ;;  %s495_s3 = inlined_call_operand.hbm [shape: f32[8,128], index: 3, kind: output, shape index: {0}]   ;;  %s496_s4 = inlined_call_operand.hbm [shape: f32[8,256], index: 4, kind: output, shape index: {1}]  }
   0x1   :  { %11 = vsyncpa [#allocation6], 0 }
   0x2   :  { %12 = vsyncpa [#allocation4], 0 }
   0x3   :  { %13 = vsyncpa [#allocation9], 0  ;;  %s421_s15 = smov [#allocation2]  }
   0x4   :  { %s21_s16 = sshll.u32 %s421_s15, 4  ;;  %s22_s16 = int_to_ptr.vmem [resolvable:$true] %s21_s16 }
   0x5   :  { %s341_s17 = scalar_lea.vmem %s22_s16, 4096  ;;  %p346_p1 = scmp.lt.s32.totalorder %s22_s16, %s22_s16 }
   0x6   :  { %p342_p0 = scmp.ne.s32.totalorder %s22_s16, %s341_s17  ;;  %p347_p2 = scmp.lt.s32.totalorder %s341_s17, %s341_s17 }
   0x8   :  { %p348_p3 = por %p347_p2, %p346_p1 }
   0xa   :  { %p349_p4 = pnand %p348_p3, %p342_p0 }
   0xc   :  { %352 = shalt.err (!%p349_p4)
}
   0xd   :  { %s422_s18 = smov 256   ;;  %s423_s19 = smov 16  }
   0xe   :  { %27 = dma.hbm_to_vmem [thread:$0]  %s493_s1, 4096, %s22_s16, [#allocation3], %s422_s18, %s422_s18, %s423_s19  }
   0xf   :  { %s424_s22 = smov [#allocation5]  }
  0x10   :  { %s33_s23 = sshll.u32 %s424_s22, 4  ;;  %s34_s23 = int_to_ptr.vmem [resolvable:$true] %s33_s23 }
  0x11   :  { %s361_s24 = scalar_lea.vmem %s34_s23, 2048  ;;  %p366_p6 = scmp.lt.s32.totalorder %s34_s23, %s34_s23 }
  0x12   :  { %p362_p5 = scmp.ne.s32.totalorder %s34_s23, %s361_s24  ;;  %p367_p7 = scmp.lt.s32.totalorder %s361_s24, %s361_s24 }
  0x14   :  { %p368_p8 = por %p367_p7, %p366_p6 }
  0x16   :  { %p369_p9 = pnand %p368_p8, %p362_p5 }
  0x18   :  { %372 = shalt.err (!%p369_p9)
}
  0x19   :  { %s425_s25 = smov 128   ;;  %s426_s26 = smov 8  }
  0x1a   :  { %39 = dma.hbm_to_vmem [thread:$0]  %s494_s2, 2048, %s34_s23, [#allocation6], %s425_s25, %s425_s25, %s426_s26  }
  0x1b   :  { %413 = dma.done.wait [#allocation3], 4096  }
  0x1c   :  { %414 = vsyncadd [#allocation3], 4294963200 }
  0x1d   :  { %415 = dma.done.wait [#allocation6], 2048  }
  0x1e   :  { %416 = vsyncadd [#allocation6], 4294965248  ;;  %v427_v0 = vmov 0.0   ;;  %vm428_vm0 = vmmov 0   ;;  %v79_v1 = vld [vmem:[#allocation2 + $0xf8] sm:$0xff]  ;;  %v78_v3 = vld [vmem:[#allocation2 + $0xf0] sm:$0xff] }
  0x1f   :  { %288 = vmatprep.subr.mxu1 %v427_v0  ;;  %320 = vmatprep.mubr.msk.f32.mxu1 %vm428_vm0, %v427_v0  ;;  %v168_v2 = vld [vmem:[#allocation5 + $0x78] sm:$0xff]  ;;  %v77_v4 = vld [vmem:[#allocation2 + $0xe8] sm:$0xff]  ;;  %v167_v5 = vld [vmem:[#allocation5 + $0x70] sm:$0xff]  ;;  %s429_s5 = smov [#allocation7]   ;;  %s430_s7 = smov [#allocation8]  }
  0x20   :  { %144 = vmatprep.mubr.f32.mxu0 %v427_v0  ;;  %80 = vmatprep.subr.mxu0 %v79_v1  ;;  %v76_v6 = vld [vmem:[#allocation2 + $0xe0] sm:$0xff]  ;;  %v75_v7 = vld [vmem:[#allocation2 + $0xd8] sm:$0xff]  ;;  %v166_v8 = vld [vmem:[#allocation5 + $0x68] sm:$0xff]  ;;  %s247_s6 = sshll.u32 %s429_s5, 4  ;;  %s257_s8 = sshll.u32 %s430_s7, 4  ;;  %s248_s6 = int_to_ptr.vmem [resolvable:$true] %s247_s6  ;;  %s258_s8 = int_to_ptr.vmem [resolvable:$true] %s257_s8 }
  0x21   :  { %289 = vmatpush3.msra.mxu1 %v168_v2  ;;  %81 = vmatpush1.msra.mxu0 %v78_v3  ;;  %v74_v9 = vld [vmem:[#allocation2 + $0xd0] sm:$0xff]  ;;  %v73_v10 = vld [vmem:[#allocation2 + $0xc8] sm:$0xff]  ;;  %v165_v11 = vld [vmem:[#allocation5 + $0x60] sm:$0xff]  ;;  %s373_s9 = scalar_lea.vmem %s248_s6, 128  ;;  %p378_p11 = scmp.lt.s32.totalorder %s248_s6, %s248_s6 }
  0x22   :  { %290 = vmatprep.subr.mxu1 %v427_v0  ;;  %82 = vmatprep.subr.mxu0 %v77_v4  ;;  %v72_v12 = vld [vmem:[#allocation2 + $0xc0] sm:$0xff]  ;;  %v71_v13 = vld [vmem:[#allocation2 + $0xb8] sm:$0xff]  ;;  %v70_v15 = vld [vmem:[#allocation2 + $0xb0] sm:$0xff]  ;;  %p374_p10 = scmp.ne.s32.totalorder %s248_s6, %s373_s9  ;;  %p379_p12 = scmp.lt.s32.totalorder %s373_s9, %s373_s9 }
  0x23   :  { %291 = vmatpush3.msra.mxu1 %v167_v5  ;;  %83 = vmatpush1.msra.mxu0 %v76_v6  ;;  %v164_v14 = vld [vmem:[#allocation5 + $0x58] sm:$0xff]  ;;  %v69_v16 = vld [vmem:[#allocation2 + $0xa8] sm:$0xff]  ;;  %v163_v17 = vld [vmem:[#allocation5 + $0x50] sm:$0xff] }
  0x24   :  { %292 = vmatprep.subr.mxu1 %v427_v0  ;;  %84 = vmatprep.subr.mxu0 %v75_v7  ;;  %v68_v18 = vld [vmem:[#allocation2 + $0xa0] sm:$0xff]  ;;  %v67_v19 = vld [vmem:[#allocation2 + $0x98] sm:$0xff]  ;;  %v162_v20 = vld [vmem:[#allocation5 + $0x48] sm:$0xff]  ;;  %p380_p13 = por %p379_p12, %p378_p11 }
  0x25   :  { %293 = vmatpush3.msra.mxu1 %v166_v8  ;;  %85 = vmatpush1.msra.mxu0 %v74_v9  ;;  %v66_v21 = vld [vmem:[#allocation2 + $0x90] sm:$0xff]  ;;  %v65_v22 = vld [vmem:[#allocation2 + $0x88] sm:$0xff]  ;;  %v161_v23 = vld [vmem:[#allocation5 + $0x40] sm:$0xff] }
  0x26   :  { %294 = vmatprep.subr.mxu1 %v427_v0  ;;  %86 = vmatprep.subr.mxu0 %v73_v10  ;;  %v64_v24 = vld [vmem:[#allocation2 + $0x80] sm:$0xff]  ;;  %v63_v25 = vld [vmem:[#allocation2 + $0x78] sm:$0xff]  ;;  %v62_v27 = vld [vmem:[#allocation2 + $0x70] sm:$0xff]  ;;  %p381_p0 = pnand %p380_p13, %p374_p10 }
  0x27   :  { %295 = vmatpush3.msra.mxu1 %v165_v11  ;;  %87 = vmatpush1.msra.mxu0 %v72_v12  ;;  %v160_v26 = vld [vmem:[#allocation5 + $0x38] sm:$0xff]  ;;  %v61_v28 = vld [vmem:[#allocation2 + $0x68] sm:$0xff]  ;;  %v159_v29 = vld [vmem:[#allocation5 + $0x30] sm:$0xff] }
  0x28   :  { %296 = vmatprep.subr.mxu1 %v427_v0  ;;  %88 = vmatprep.subr.mxu0 %v71_v13  ;;  %v60_v30 = vld [vmem:[#allocation2 + $0x60] sm:$0xff]  ;;  %v59_v31 = vld [vmem:[#allocation2 + $0x58] sm:$0xff]  ;;  %v158_v32 = vld [vmem:[#allocation5 + $0x28] sm:$0xff] }
  0x29   :  { %297 = vmatpush3.msra.mxu1 %v164_v14  ;;  %89 = vmatpush1.msra.mxu0 %v70_v15  ;;  %v58_v33 = vld [vmem:[#allocation2 + $0x50] sm:$0xff]  ;;  %v57_v34 = vld [vmem:[#allocation2 + $0x48] sm:$0xff]  ;;  %v157_v35 = vld [vmem:[#allocation5 + $0x20] sm:$0xff] }
  0x2a   :  { %298 = vmatprep.subr.mxu1 %v427_v0  ;;  %90 = vmatprep.subr.mxu0 %v69_v16  ;;  %v56_v36 = vld [vmem:[#allocation2 + $0x40] sm:$0xff]  ;;  %v55_v37 = vld [vmem:[#allocation2 + $0x38] sm:$0xff]  ;;  %v54_v39 = vld [vmem:[#allocation2 + $0x30] sm:$0xff] }
  0x2b   :  { %299 = vmatpush3.msra.mxu1 %v163_v17  ;;  %91 = vmatpush1.msra.mxu0 %v68_v18  ;;  %v156_v38 = vld [vmem:[#allocation5 + $0x18] sm:$0xff]  ;;  %v53_v40 = vld [vmem:[#allocation2 + $0x28] sm:$0xff]  ;;  %v155_v41 = vld [vmem:[#allocation5 + $0x10] sm:$0xff] }
  0x2c   :  { %300 = vmatprep.subr.mxu1 %v427_v0  ;;  %92 = vmatprep.subr.mxu0 %v67_v19  ;;  %v52_v42 = vld [vmem:[#allocation2 + $0x20] sm:$0xff]  ;;  %v51_v43 = vld [vmem:[#allocation2 + $0x18] sm:$0xff]  ;;  %v154_v44 = vld [vmem:[#allocation5 + $0x8] sm:$0xff] }
  0x2d   :  { %301 = vmatpush3.msra.mxu1 %v162_v20  ;;  %93 = vmatpush1.msra.mxu0 %v66_v21  ;;  %v50_v45 = vld [vmem:[#allocation2 + $0x10] sm:$0xff]  ;;  %v49_v46 = vld [vmem:[#allocation2 + $0x8] sm:$0xff]  ;;  %v153_v47 = vld [vmem:[#allocation5] sm:$0xff] }
  0x2e   :  { %302 = vmatprep.subr.mxu1 %v427_v0  ;;  %94 = vmatprep.subr.mxu0 %v65_v22  ;;  %v48_v48 = vld [vmem:[#allocation2] sm:$0xff]  ;;  %v47_v50 = vld [vmem:[%s492_s0 + $0x8] sm:$0xff] }
  0x2f   :  { %303 = vmatpush3.msra.mxu1 %v161_v23  ;;  %95 = vmatpush1.msra.mxu0 %v64_v24  ;;  %v46_v49 = vld [vmem:[%s492_s0] sm:$0xff] }
  0x30   :  { %304 = vmatprep.subr.mxu1 %v427_v0  ;;  %96 = vmatprep.subr.mxu0 %v63_v25 }
  0x31   :  { %305 = vmatpush3.msra.mxu1 %v160_v26  ;;  %97 = vmatpush1.msra.mxu0 %v62_v27 }
  0x32   :  { %306 = vmatprep.subr.mxu1 %v427_v0  ;;  %98 = vmatprep.subr.mxu0 %v61_v28 }
  0x33   :  { %307 = vmatpush3.msra.mxu1 %v159_v29  ;;  %99 = vmatpush1.msra.mxu0 %v60_v30 }
  0x34   :  { %308 = vmatprep.subr.mxu1 %v427_v0  ;;  %100 = vmatprep.subr.mxu0 %v59_v31 }
  0x35   :  { %309 = vmatpush3.msra.mxu1 %v158_v32  ;;  %101 = vmatpush1.msra.mxu0 %v58_v33 }
  0x36   :  { %310 = vmatprep.subr.mxu1 %v427_v0  ;;  %102 = vmatprep.subr.mxu0 %v57_v34 }
  0x37   :  { %311 = vmatpush3.msra.mxu1 %v157_v35  ;;  %103 = vmatpush1.msra.mxu0 %v56_v36 }
  0x38   :  { %312 = vmatprep.subr.mxu1 %v427_v0  ;;  %104 = vmatprep.subr.mxu0 %v55_v37 }
  0x39   :  { %313 = vmatpush3.msra.mxu1 %v156_v38  ;;  %105 = vmatpush1.msra.mxu0 %v54_v39 }
  0x3a   :  { %314 = vmatprep.subr.mxu1 %v427_v0  ;;  %106 = vmatprep.subr.mxu0 %v53_v40 }
  0x3b   :  { %315 = vmatpush3.msra.mxu1 %v155_v41  ;;  %107 = vmatpush1.msra.mxu0 %v52_v42 }
  0x3c   :  { %316 = vmatprep.subr.mxu1 %v427_v0  ;;  %108 = vmatprep.subr.mxu0 %v51_v43 }
  0x3d   :  { %317 = vmatpush3.msra.mxu1 %v154_v44  ;;  %109 = vmatpush1.msra.mxu0 %v50_v45 }
  0x3e   :  { %318 = vmatprep.subr.mxu1 %v427_v0  ;;  %110 = vmatprep.subr.mxu0 %v49_v46 }
  0x3f   :  { %319 = vmatpush3.msra.mxu1 %v153_v47  ;;  %111 = vmatpush1.msra.mxu0 %v48_v48 }
  0x40   :  { %321 = vmatmul.mubr.f32.vlgmr.msra.gmra.mxu1 %v46_v49  ;;  %145 = vmatmul.mubr.f32.vlgmr.msra.gmra.mxu0 %v46_v49 }
 0x100   :  { %v235_v51 = vpop.f32.mrf.mxu1  ;;  %v146_v53 = vpop.f32.mrf.mxu0 }
 0x101   :  { %v239_v52 = vsub.f32 %v47_v50, %v235_v51  ;;  %151 = vst [vmem:[#allocation8] sm:$0xff] %v146_v53 }
 0x102   :  { %v322_v54 = vpop.f32.mrf.mxu1  ;;  %v148_v55 = vpop.f32.mrf.mxu0 }
 0x103   :  { %240 = vst [vmem:[#allocation7] sm:$0xff] %v239_v52  ;;  %152 = vst [vmem:[#allocation8 + $0x8] sm:$0xff] %v148_v55 }
 0x104   :  { %384 = shalt.err (!%p381_p0)
}
 0x105   :  { %250 = dma.vmem_to_hbm [thread:$0]  %s248_s6, 128, %s495_s3, [#allocation4]  }
 0x106   :  { %s393_s11 = scalar_lea.vmem %s258_s8, 256  ;;  %p398_p2 = scmp.lt.s32.totalorder %s258_s8, %s258_s8 }
 0x107   :  { %p394_p1 = scmp.ne.s32.totalorder %s258_s8, %s393_s11  ;;  %p399_p3 = scmp.lt.s32.totalorder %s393_s11, %s393_s11 }
 0x109   :  { %p400_p4 = por %p399_p3, %p398_p2 }
 0x10b   :  { %p401_p5 = pnand %p400_p4, %p394_p1 }
 0x10d   :  { %404 = shalt.err (!%p401_p5)
}
 0x10e   :  { %260 = dma.vmem_to_hbm [thread:$0]  %s258_s8, 256, %s496_s4, [#allocation9]  }
 0x10f   :  { %417 = dma.done.wait [#allocation4], 128  }
 0x110   :  { %418 = vsyncadd [#allocation4], 4294967168 }
 0x111   :  { %419 = dma.done.wait [#allocation9], 256  }
 0x112   :  { %420 = vsyncadd [#allocation9], 4294967040 }
 0x113   :  { %267 = vsyncpa [#allocation3], 1 }
 0x114   :  { %268 = vsyncpa [#allocation6], 1 }
 0x115   :  { %269 = vsyncpa [#allocation4], 1 }
 0x116   :  { %270 = vsyncpa [#allocation9], 1 }

</bundles_post_ra>
